<compile_context>
chip_gen: v5e
topology: v5e:2x2
jax: 0.10.0
libtpu: 0.0.40
codegen_flags: <defaults>
</compile_context>

<pallas_src>
import jax
import jax.numpy as jnp
from jax.experimental import pallas as pl
from jax.experimental.pallas import tpu as pltpu

_LANES = 128
_SUBLANES = 8
_MIN_BLOCK = _LANES * _SUBLANES            # 1024 edges = one (8,128) f32 tile


def _stress_kernel(diff_ref, invd_ref, acc_ref):
    """diff_ref: (ndim, R, 128); invd_ref: (R, 128); acc_ref: (R, 128) resident."""
    # Zero this outer-chunk's accumulator block at the start of its inner loop.
    @pl.when(pl.program_id(1) == 0)
    def _():
        acc_ref[...] = jnp.zeros_like(acc_ref)

    ndim = diff_ref.shape[0]
    c = diff_ref[0]                         # (R, 128)
    sq = c * c
    for k in range(1, ndim):                # static unroll over coordinate dim
        c = diff_ref[k]
        sq = sq + c * c

    eu = jnp.sqrt(sq)                       # EUP slot; hidden under VPU/DMA
    invd = invd_ref[...]                    # (R, 128); 0 marks padded edges
    r = eu * invd - 1.0                     # == (eu - d) / d  (|.| redundant before ^2)
    stress = jnp.where(invd != 0.0, r * r, 0.0)
    # Elementwise accumulate; no per-iteration reduction tree.
    acc_ref[...] += stress


def _num_tensorcores_per_device():
    # Dual-TensorCore devices benefit from a 'parallel' outer grid axis.
    try:
        kind = jax.devices()[0].device_kind.lower()
    except Exception:
        return 1
    return 2 if any(t in kind for t in ("v4", "v5p", "v7")) else 1


def stress(node_pos, full_edge_index, full_edge_attr, batch_vec, num_graphs,
           *, block_edges=256 * 1024, n_outer=None):
    """node_pos: (N, D) f32; full_edge_index: (2, E) i32;
    full_edge_attr: (E, F) f32; batch_vec: (N,) i32.

    batch_vec is unused: with reduce == mean,
    mean(scatter_sum(edge_stress, graph)) == sum(edge_stress) / num_graphs.
    """
    del batch_vec
    node_pos = node_pos.astype(jnp.float32)
    num_edges = int(full_edge_index.shape[1])
    ndim = int(node_pos.shape[1])

    # ---- static tiling arithmetic --------------------------------------
    e_ceil = -(-num_edges // _MIN_BLOCK) * _MIN_BLOCK
    blk = min(int(block_edges), e_ceil)
    blk = max(_MIN_BLOCK, (blk // _MIN_BLOCK) * _MIN_BLOCK)
    n_chunks = -(-e_ceil // blk)
    if n_outer is None:
        n_outer = 2 if (_num_tensorcores_per_device() >= 2 and n_chunks >= 2) else 1
    n_outer = max(1, min(int(n_outer), n_chunks))
    n_inner = -(-n_chunks // n_outer)
    n_chunks = n_inner * n_outer
    e_pad = n_chunks * blk
    pad = e_pad - num_edges
    rows_blk = blk // _LANES                # multiple of 8
    n_rows = e_pad // _LANES

    # ---- wrapper glue: pad only the SMALL arrays, gather lane-dense -----
    src = jnp.pad(full_edge_index[0].astype(jnp.int32), (0, pad))
    dst = jnp.pad(full_edge_index[1].astype(jnp.int32), (0, pad))
    inv_d = jnp.pad(1.0 / full_edge_attr[:, 0].astype(jnp.float32), (0, pad))

    pos_t = node_pos.T                      # (ndim, N): tiny one-off transpose
    diff = pos_t[:, src] - pos_t[:, dst]    # (ndim, e_pad): fused gather + subtract
    diff = diff.reshape(ndim, n_rows, _LANES)     # contiguous reshape (free)
    inv_d = inv_d.reshape(n_rows, _LANES)

    def diff_map(o, i):
        return (0, o * n_inner + i, 0)

    def invd_map(o, i):
        return (o * n_inner + i, 0)

    partial = pl.pallas_call(
        _stress_kernel,
        out_shape=jax.ShapeDtypeStruct((n_outer * rows_blk, _LANES), jnp.float32),
        grid_spec=pltpu.PrefetchScalarGridSpec(
            num_scalar_prefetch=0,
            grid=(n_outer, n_inner),
            in_specs=[
                pl.BlockSpec((ndim, rows_blk, _LANES), diff_map),   # diff stream
                pl.BlockSpec((rows_blk, _LANES), invd_map),         # 1/d stream
            ],
            out_specs=pl.BlockSpec((rows_blk, _LANES), lambda o, i: (o, 0)),
        ),
        compiler_params=pltpu.CompilerParams(
            dimension_semantics=("parallel", "arbitrary"),
            vmem_limit_bytes=48 * 1024 * 1024),
    )(diff, inv_d)

    # Single final reduction over a tiny array, then the mean over graphs.
    return jnp.sum(partial) / num_graphs


# --------------------------- test harness --------------------------------

def _make_full_graph_batch(key, num_graphs, nodes_per_graph, dim):
    k1, k2 = jax.random.split(key)
    n_nodes = num_graphs * nodes_per_graph
    node_pos = jax.random.normal(k1, (n_nodes, dim), dtype=jnp.float32)
    batch_vec = jnp.repeat(jnp.arange(num_graphs, dtype=jnp.int32), nodes_per_graph)
    src, dst = [], []
    for g in range(num_graphs):
        base = g * nodes_per_graph
        for i in range(nodes_per_graph):
            for j in range(nodes_per_graph):
                if i != j:
                    src.append(base + i)
                    dst.append(base + j)
    full_edge_index = jnp.array([src, dst], dtype=jnp.int32)
    n_edges = full_edge_index.shape[1]
    full_edge_attr = jax.random.uniform(
        k2, (n_edges, 1), minval=0.5, maxval=2.0, dtype=jnp.float32)
    return node_pos, full_edge_index, full_edge_attr, batch_vec


def _reference(node_pos, full_edge_index, full_edge_attr, batch_vec, num_graphs):
    start = node_pos[full_edge_index[0]]
    end = node_pos[full_edge_index[1]]
    eu = jnp.linalg.norm(start - end, axis=1)
    d = full_edge_attr[:, 0]
    edge_stress = jnp.square(jnp.abs(eu - d) / d)
    idx = batch_vec[full_edge_index[0]]
    graph_stress = jax.ops.segment_sum(edge_stress, idx, num_segments=num_graphs)
    return jnp.mean(graph_stress)


if __name__ == "__main__":
    key = jax.random.PRNGKey(0)
    key1, key2 = jax.random.split(key)

    # Test 1: small batch, single chunk (112 edges -> one 1024-edge block).
    num_graphs = 2
    inputs = _make_full_graph_batch(key1, num_graphs, nodes_per_graph=8, dim=2)
    out = jax.block_until_ready(stress(*inputs, num_graphs))
    ref = _reference(*inputs, num_graphs)
    assert jnp.allclose(out, ref, rtol=2e-4, atol=1e-4), (out, ref)

    # Test 2: 3D coords, multi-chunk grid with tiny blocks (2976 edges).
    num_graphs2 = 3
    inputs2 = _make_full_graph_batch(key2, num_graphs2, nodes_per_graph=32, dim=3)
    out2 = jax.block_until_ready(stress(*inputs2, num_graphs2, block_edges=1024))
    ref2 = _reference(*inputs2, num_graphs2)
    assert jnp.allclose(out2, ref2, rtol=2e-4, atol=1e-4), (out2, ref2)

    # Test 3: force the 2-way 'parallel' outer split (rounding + padded chunks).
    out3 = jax.block_until_ready(
        stress(*inputs2, num_graphs2, block_edges=1024, n_outer=2))
    assert jnp.allclose(out3, ref2, rtol=2e-4, atol=1e-4), (out3, ref2)

    print("KERNEL_OK")
</pallas_src>

<mosaic_0001>
module attributes {stable_mosaic.version = 11 : i64} {
  func.func @_stress_kernel(%arg0: i32, %arg1: i32, %arg2: memref<2x8x128xf32, #tpu.memory_space<vmem>>, %arg3: memref<8x128xf32, #tpu.memory_space<vmem>>, %arg4: memref<8x128xf32, #tpu.memory_space<vmem>>) attributes {dimension_semantics = [#tpu.dimension_semantics<parallel>, #tpu.dimension_semantics<arbitrary>], iteration_bounds = array<i64: 1, 1>, scalar_prefetch = 0 : i64, scratch_operands = 0 : i64, tpu.core_type = #tpu.core_type<tc>, window_params = [{transform_indices = @transform_0, window_bounds = array<i64: 2, 8, 128>}, {transform_indices = @transform_1, window_bounds = array<i64: 8, 128>}, {transform_indices = @transform_2, window_bounds = array<i64: 8, 128>}]} {
    %c0_i32 = arith.constant 0 : i32
    %0 = arith.cmpi eq, %arg1, %c0_i32 : i32
    %1 = arith.extui %0 : i1 to i32
    %c0_i32_0 = arith.constant 0 : i32
    %2 = arith.cmpi ne, %1, %c0_i32_0 : i32
    scf.if %2 {
      %cst_13 = arith.constant 0.000000e+00 : f32
      %23 = vector.broadcast %cst_13 : f32 to vector<8x128xf32>
      %c0_14 = arith.constant 0 : index
      %c0_15 = arith.constant 0 : index
      %24 = vector.load %arg4[%c0_14, %c0_15] : memref<8x128xf32, #tpu.memory_space<vmem>>, vector<8x128xf32>
      tpu.vector_store %arg4[%c0_14, %c0_15], %23 {strides = array<i32>} : memref<8x128xf32, #tpu.memory_space<vmem>>, vector<8x128xf32>,
    } else {
    }
    %c0 = arith.constant 0 : index
    %c0_1 = arith.constant 0 : index
    %c0_2 = arith.constant 0 : index
    %3 = vector.load %arg2[%c0, %c0_1, %c0_2] : memref<2x8x128xf32, #tpu.memory_space<vmem>>, vector<1x8x128xf32>
    %4 = vector.shape_cast %3 : vector<1x8x128xf32> to vector<8x128xf32>
    %5 = arith.mulf %4, %4 : vector<8x128xf32>
    %c1 = arith.constant 1 : index
    %c0_3 = arith.constant 0 : index
    %c0_4 = arith.constant 0 : index
    %6 = vector.load %arg2[%c1, %c0_3, %c0_4] : memref<2x8x128xf32, #tpu.memory_space<vmem>>, vector<1x8x128xf32>
    %7 = vector.shape_cast %6 : vector<1x8x128xf32> to vector<8x128xf32>
    %8 = arith.mulf %7, %7 : vector<8x128xf32>
    %9 = arith.addf %5, %8 : vector<8x128xf32>
    %10 = math.sqrt %9 : vector<8x128xf32>
    %c0_5 = arith.constant 0 : index
    %c0_6 = arith.constant 0 : index
    %11 = vector.load %arg3[%c0_5, %c0_6] : memref<8x128xf32, #tpu.memory_space<vmem>>, vector<8x128xf32>
    %12 = arith.mulf %10, %11 : vector<8x128xf32>
    %cst = arith.constant 1.000000e+00 : f32
    %13 = vector.broadcast %cst : f32 to vector<8x128xf32>
    %14 = arith.subf %12, %13 : vector<8x128xf32>
    %cst_7 = arith.constant 0.000000e+00 : f32
    %15 = vector.broadcast %cst_7 : f32 to vector<8x128xf32>
    %16 = arith.cmpf one, %11, %15 : vector<8x128xf32>
    %17 = arith.mulf %14, %14 : vector<8x128xf32>
    %cst_8 = arith.constant 0.000000e+00 : f32
    %18 = vector.broadcast %cst_8 : f32 to vector<8x128xf32>
    %19 = arith.select %16, %17, %18 : vector<8x128xi1>, vector<8x128xf32>
    %c0_9 = arith.constant 0 : index
    %c0_10 = arith.constant 0 : index
    %20 = vector.load %arg4[%c0_9, %c0_10] : memref<8x128xf32, #tpu.memory_space<vmem>>, vector<8x128xf32>
    %21 = arith.addf %20, %19 : vector<8x128xf32>
    %c0_11 = arith.constant 0 : index
    %c0_12 = arith.constant 0 : index
    %22 = vector.load %arg4[%c0_11, %c0_12] : memref<8x128xf32, #tpu.memory_space<vmem>>, vector<8x128xf32>
    tpu.vector_store %arg4[%c0_11, %c0_12], %21 {strides = array<i32>} : memref<8x128xf32, #tpu.memory_space<vmem>>, vector<8x128xf32>,
    return
  }
  func.func @transform_0(%arg0: i32, %arg1: i32) -> (i32, i32, i32) {
    %c1_i32 = arith.constant 1 : i32
    %0 = arith.muli %arg0, %c1_i32 : i32
    %1 = arith.addi %0, %arg1 : i32
    %c0_i32 = arith.constant 0 : i32
    %c0_i32_0 = arith.constant 0 : i32
    %c0_i32_1 = arith.constant 0 : i32
    return %c0_i32, %1, %c0_i32_0 : i32, i32, i32
  }
  func.func @transform_1(%arg0: i32, %arg1: i32) -> (i32, i32) {
    %c1_i32 = arith.constant 1 : i32
    %0 = arith.muli %arg0, %c1_i32 : i32
    %1 = arith.addi %0, %arg1 : i32
    %c0_i32 = arith.constant 0 : i32
    %c0_i32_0 = arith.constant 0 : i32
    return %1, %c0_i32 : i32, i32
  }
  func.func @transform_2(%arg0: i32, %arg1: i32) -> (i32, i32) {
    %c0_i32 = arith.constant 0 : i32
    %c0_i32_0 = arith.constant 0 : i32
    return %arg0, %c0_i32 : i32, i32
  }
}

</mosaic_0001>

<bundles_post_ra>
// kernel: tpu_custom_call.1
= control target key start
LH: loop header
LB: loop body
LE: loop exit
PB: predicated region body
PF: predicated region fallthrough
CT: control target
= control target key end

     0   :  { %7 = vsyncpa [#allocation3], 0  ;;  %s216_s0 = inlined_call_operand.hbm [shape: f32[2,8,128], index: 0, kind: input, shape index: {}]   ;;  %s217_s1 = inlined_call_operand.hbm [shape: f32[8,128], index: 1, kind: input, shape index: {}]   ;;  %s218_s2 = inlined_call_operand.hbm [shape: f32[8,128], index: 2, kind: output, shape index: {}]  }
   0x1   :  { %8 = vsyncpa [#allocation6], 0 }
   0x2   :  { %9 = vsyncpa [#allocation4], 0  ;;  %s17_s11 = sshll.u32 %s216_s0, 4  ;;  %s187_s12 = smov [#allocation2]   ;;  %s18_s11 = int_to_ptr.hbm [resolvable:$true] %s17_s11 }
   0x3   :  { %s19_s13 = sshll.u32 %s187_s12, 4  ;;  %s34_s16 = sshll.u32 %s217_s1, 4  ;;  %s20_s13 = int_to_ptr.vmem [resolvable:$true] %s19_s13  ;;  %s35_s16 = int_to_ptr.hbm [resolvable:$true] %s34_s16 }
   0x4   :  { %s188_s17 = smov 128   ;;  %s189_s18 = smov 8  }
   0x5   :  { %25 = dma.hbm_to_vmem [thread:$0]  %s18_s11, 256, %s20_s13, [#allocation3], %s188_s17, %s188_s17, %s189_s18  }
   0x6   :  { %s190_s19 = smov [#allocation5]  }
   0x7   :  { %s36_s20 = sshll.u32 %s190_s19, 4  ;;  %s37_s20 = int_to_ptr.vmem [resolvable:$true] %s36_s20 }
   0x8   :  { %39 = dma.hbm_to_vmem [thread:$0]  %s35_s16, 128, %s37_s20, [#allocation6]  }
   0x9   :  { %181 = dma.done.wait [#allocation3], 256  }
   0xa   :  { %182 = vsyncadd [#allocation3], 4294967040 }
   0xb   :  { %183 = dma.done.wait [#allocation6], 128  }
   0xc   :  { %184 = vsyncadd [#allocation6], 4294967168  ;;  %v55_v0 = vld [vmem:[#allocation2] sm:$0xff]  ;;  %v58_v1 = vld [vmem:[#allocation2 + $0x8] sm:$0xff]  ;;  %s191_s0 = smov [#allocation7]   ;;  %s89_s23 = sshll.u32 %s218_s2, 4  ;;  %s90_s23 = int_to_ptr.hbm [resolvable:$true] %s89_s23 }
   0xd   :  { %v56_v2 = vmul.f32 %v55_v0, %v55_v0  ;;  %v59_v3 = vmul.f32 %v58_v1, %v58_v1  ;;  %v73_v13 = vld [vmem:[#allocation5] sm:$0xff]  ;;  %s87_s1 = sshll.u32 %s191_s0, 4  ;;  %s88_s1 = int_to_ptr.vmem [resolvable:$true] %s87_s1 }
   0xe   :  { %vm76_vm2 = vcmp.ne.f32.partialorder %v73_v13, 0.0 }
   0xf   :  { %v60_v4 = vadd.f32 %v59_v3, %v56_v2 }
  0x11   :  { %107 = vrsqrt.f32 %v60_v4  ;;  %vm68_vm0 = vcmp.eq.f32.partialorder %v60_v4, inf  ;;  %v71_v11 = vand.u32 2147483648, %v60_v4  ;;  %vm70_vm1 = vcmp.eq.f32.partialorder %v60_v4, 0.0 }
  0x17   :  { %v108_v5 = vpop.eup %107 }
  0x18   :  { %v62_v6 = vmul.f32 %v108_v5, %v60_v4 }
  0x1a   :  { %v63_v7 = vmul.f32 %v108_v5, %v62_v6 }
  0x1c   :  { %v64_v8 = vmul.f32 0.5, %v63_v7 }
  0x1e   :  { %v65_v9 = vsub.f32 1.5, %v64_v8 }
  0x20   :  { %v66_v10 = vmul.f32 %v108_v5, %v65_v9 }
  0x22   :  { %v67_v12 = vmul.f32 %v66_v10, %v60_v4 }
  0x24   :  { %v69_v14 = vsel %vm68_vm0, %v60_v4, %v67_v12 }
  0x25   :  { %v72_v15 = vsel %vm70_vm1, %v71_v11, %v69_v14 }
  0x26   :  { %v74_v16 = vmul.f32 %v73_v13, %v72_v15 }
  0x28   :  { %v100_v17 = vadd.f32 -1.0, %v74_v16 }
  0x2a   :  { %v77_v18 = vmul.f32 %v100_v17, %v100_v17 }
  0x2c   :  { %v78_v19 = vsel %vm76_vm2, %v77_v18, 0.0 }
  0x2d   :  { %81 = vst [vmem:[#allocation7] sm:$0xff] %v78_v19 }
  0x2e   :  { %92 = dma.vmem_to_hbm [thread:$0]  %s88_s1, 128, %s90_s23, [#allocation4]  }
  0x2f   :  { %185 = dma.done.wait [#allocation4], 128  }
  0x30   :  { %186 = vsyncadd [#allocation4], 4294967168 }
  0x31   :  { %97 = vsyncpa [#allocation3], 1 }
  0x32   :  { %98 = vsyncpa [#allocation6], 1 }
  0x33   :  { %99 = vsyncpa [#allocation4], 1 }

</bundles_post_ra>
